<compile_context>
chip_gen: v7x
topology: tpu7x:2x2x1
jax: 0.10.0
libtpu: 0.0.40
codegen_flags: <defaults>
</compile_context>

<pallas_src>
import functools

import jax
import jax.numpy as jnp
import numpy as np
from jax import lax
from jax.experimental import pallas as pl
from jax.experimental.pallas import tpu as pltpu


def _unit_skip_kernel(x_ref, w_ref, b_ref, o_ref, rhs_ref, *, K, pad, C_in, CS, T, V):
    # x_ref  : (Nb, C_in, T*V)   bf16  lane-dense flattened input block
    # w_ref  : (TCo, K*CS)       bf16  BN-folded weights; tap dk occupies cols [dk*CS, dk*CS+C_in)
    # b_ref  : (TCo, 1)          f32   BN-folded bias (kept f32)
    # o_ref  : (Nb, TCo, T*V)    f32   lane-dense output block
    # rhs_ref: (K*CS, Nb*T*V)    bf16  im2col scratch -> ONE fused MXU matmul per grid step
    TV = T * V
    Nb = x_ref.shape[0]

    # Keep the CS-padding rows finite: their weight columns are exact zeros, but 0 * NaN from
    # uninitialized VMEM would still poison the f32 accumulation.  Zero ONLY these rows, every
    # step (no program_id==0 guard: under "parallel" sharding a core may never run step 0).
    # For realistic C_in (a multiple of the sublane packing) this loop body is empty.
    if CS > C_in:
        for dk in range(K):
            rhs_ref[dk * CS + C_in:(dk + 1) * CS, :] = jnp.zeros(
                (CS - C_in, Nb * TV), rhs_ref.dtype)

    # im2col straight from x_ref (no padded-halo buffer): tap dk of the temporal conv is the
    # flat (T*V) input shifted by (dk - pad) * V lanes; the lanes exposed by the shift are the
    # conv's zero padding and are written explicitly (small, statically-known edge regions).
    for n in range(Nb):
        col0 = n * TV
        for dk in range(K):
            row0 = dk * CS
            shift = dk - pad
            z = abs(shift) * V
            if z >= TV:  # degenerate tap (T <= |shift|): whole window is padding
                rhs_ref[row0:row0 + C_in, col0:col0 + TV] = jnp.zeros(
                    (C_in, TV), rhs_ref.dtype)
            elif shift < 0:
                rhs_ref[row0:row0 + C_in, col0:col0 + z] = jnp.zeros(
                    (C_in, z), rhs_ref.dtype)
                rhs_ref[row0:row0 + C_in, col0 + z:col0 + TV] = x_ref[n, :, :TV - z]
            elif shift > 0:
                rhs_ref[row0:row0 + C_in, col0 + TV - z:col0 + TV] = jnp.zeros(
                    (C_in, z), rhs_ref.dtype)
                rhs_ref[row0:row0 + C_in, col0:col0 + TV - z] = x_ref[n, :, z:]
            else:
                rhs_ref[row0:row0 + C_in, col0:col0 + TV] = x_ref[n, :, :]

    # Single fused MXU matmul: all K taps, all Nb elements (bf16 in, f32 accumulate),
    # then the f32 bias on the VPU.
    y = jnp.dot(w_ref[...], rhs_ref[...], preferred_element_type=jnp.float32)  # (TCo, Nb*TV)
    y = y + b_ref[...]

    for n in range(Nb):  # lane-aligned slices when TV % 128 == 0
        o_ref[n] = y[:, n * TV:(n + 1) * TV].astype(o_ref.dtype)


def unit_skip_forward(x, conv_w, conv_b, bn_gamma, bn_beta, bn_mean, bn_var,
                      *, eps=1e-5, stride=1, compute_dtype=jnp.bfloat16):
    """x: (N, C_in, T, V) f32; conv_w: (C_out, C_in, K, 1); conv_b, bn_*: (C_out,) inference-mode
    BatchNorm2d params / running stats.  Returns bn(conv(x)) with shape (N, C_out, T, V), f32."""
    assert stride == 1  # TODO(synk): support stride > 1 (strided temporal windows in the im2col)
    N, C_in, T, V = x.shape
    C_out, c_in_w, K, KW = conv_w.shape
    assert c_in_w == C_in and KW == 1
    pad = (K - 1) // 2
    TV = T * V

    # ---- Fold inference BatchNorm into the conv weights / bias (exact f32 algebra). ----
    scale = (bn_gamma / jnp.sqrt(bn_var + eps)).astype(jnp.float32)                # (C_out,)
    w_folded = (conv_w[:, :, :, 0] * scale[:, None, None]).astype(jnp.float32)     # (C_out,C_in,K)
    b_folded = ((conv_b - bn_mean) * scale + bn_beta).astype(jnp.float32)          # (C_out,)

    # ---- Fused matmul LHS (C_out, K*CS): column dk*CS + ci holds w[co, ci, dk].  Each tap slot
    #      is padded to CS rows so the in-kernel im2col stores land sublane-aligned (16-row
    #      packing for bf16, 8 for f32); pad columns are exact zeros. ----
    sub = 16 if compute_dtype == jnp.bfloat16 else 8
    CS = -(-C_in // sub) * sub
    R = K * CS
    w_slots = jnp.zeros((C_out, K, CS), jnp.float32)
    w_slots = w_slots.at[:, :, :C_in].set(jnp.transpose(w_folded, (0, 2, 1)))
    w_fused = w_slots.reshape(C_out, R).astype(compute_dtype)
    bias = b_folded.reshape(C_out, 1)  # stays f32: bias never takes the bf16 rounding hit

    # ---- Lane-dense bf16 input: flatten (T, V); HBM-bound kernel so halving bytes is the win.
    x_flat = x.reshape(N, C_in, TV).astype(compute_dtype)
    itemsize = jnp.dtype(compute_dtype).itemsize

    # ---- Generation-aware VMEM budget (v7x: 64 MiB physical; v5e/v6e: 128 MiB). ----
    try:
        vmem_cap = int(pltpu.get_tpu_info().vmem_capacity_bytes)
    except Exception:
        vmem_cap = 64 << 20  # assume the smallest (v7x-class) part if the query is unavailable
    vmem_limit = int(min(0.45 * vmem_cap, 100 << 20))   # explicit: v5e default is only 16 MiB
    budget = int(0.75 * vmem_limit)                      # headroom for Mosaic-internal scratch

    # Prefer splitting the batch axis (a C_out split re-streams all of x from HBM); only split
    # C_out when the batch axis cannot give >= 2 grid steps at all.
    tco = C_out // 2 if (N == 1 and C_out % 16 == 0) else C_out

    def _step_bytes(nb):  # all live VMEM for one grid step
        return (2 * nb * C_in * TV * itemsize            # x block (double-buffered)
                + 2 * nb * C_out * TV * 4                # f32 output block (double-buffered)
                + R * nb * TV * itemsize                 # im2col scratch
                + tco * nb * TV * 4                      # f32 matmul result slab
                + 2 * tco * R * itemsize + 2 * tco * 4)  # weight + bias blocks

    # Largest Nb (capped to bound static unrolling of the copy loop) that fits the budget while
    # keeping grid length >= 2 (both v7x TensorCores busy); non-divisor Nb allowed (ragged last
    # block is masked on writeback, and each output column depends only on its own rhs column).
    grid_min = min(2, N)
    nb = 1
    for cand in range(1, min(N, 8) + 1):
        if _step_bytes(cand) <= budget and -(-N // cand) >= grid_min:
            nb = cand
    grid_n = -(-N // nb)

    kernel = functools.partial(_unit_skip_kernel, K=K, pad=pad, C_in=C_in, CS=CS, T=T, V=V)

    out_flat = pl.pallas_call(
        kernel,
        out_shape=jax.ShapeDtypeStruct((N, C_out, TV), jnp.float32),
        grid_spec=pltpu.PrefetchScalarGridSpec(
            num_scalar_prefetch=0,
            grid=(grid_n, C_out // tco),
            in_specs=[
                pl.BlockSpec((nb, C_in, TV), lambda n, co: (n, 0, 0)),
                pl.BlockSpec((tco, R), lambda n, co: (co, 0)),
                pl.BlockSpec((tco, 1), lambda n, co: (co, 0)),
            ],
            out_specs=pl.BlockSpec((nb, tco, TV), lambda n, co: (n, co, 0)),
            scratch_shapes=[pltpu.VMEM((R, nb * TV), compute_dtype)],
        ),
        compiler_params=pltpu.CompilerParams(
            dimension_semantics=("parallel", "parallel"),
            vmem_limit_bytes=vmem_limit),
    )(x_flat, w_fused, bias)

    return out_flat.reshape(N, C_out, T, V)


def unit_skip_reference(x, conv_w, conv_b, bn_gamma, bn_beta, bn_mean, bn_var,
                        *, eps=1e-5, compute_dtype=jnp.float32):
    """Pure-JAX reference for inference-mode bn(conv(x)): BN folded into the conv (exact f32
    elementwise algebra), conv evaluated on `compute_dtype` operands with f32 accumulation and
    an f32 bias — with compute_dtype=bfloat16 this mirrors the kernel's precision exactly."""
    scale = bn_gamma / jnp.sqrt(bn_var + eps)
    w_folded = (conv_w * scale[:, None, None, None]).astype(jnp.float32)
    b_folded = (conv_b - bn_mean) * scale + bn_beta
    K = conv_w.shape[2]
    pad = (K - 1) // 2
    y = lax.conv_general_dilated(
        x.astype(compute_dtype), w_folded.astype(compute_dtype),
        window_strides=(1, 1), padding=((pad, pad), (0, 0)),
        dimension_numbers=("NCHW", "OIHW", "NCHW"),
        preferred_element_type=jnp.float32)
    return y + b_folded.reshape(1, -1, 1, 1).astype(jnp.float32)


if __name__ == "__main__":
    # Small deterministic shapes: batch=2, in_channels=4, out_channels=8, T=16, V=16,
    # kernel_size=9 (the module default), stride=1.
    N, C_in, C_out, T, V, K = 2, 4, 8, 16, 16, 9

    key = jax.random.PRNGKey(0)
    k_x, k_w, k_g, k_b, k_m, k_v = jax.random.split(key, 6)

    x = jax.random.normal(k_x, (N, C_in, T, V), dtype=jnp.float32)

    # conv_init: kaiming_normal(mode='fan_out') -> std = sqrt(2 / (C_out*K*1)); bias = 0.
    fan_out = C_out * K * 1
    conv_w = jax.random.normal(k_w, (C_out, C_in, K, 1), dtype=jnp.float32) * np.sqrt(2.0 / fan_out)
    conv_b = jnp.zeros((C_out,), dtype=jnp.float32)

    # BatchNorm2d (inference): bn_init gives weight=1 / bias=0; perturb params and running
    # stats deterministically so the BN fold is actually exercised by the check.
    bn_gamma = 1.0 + 0.1 * jax.random.normal(k_g, (C_out,), dtype=jnp.float32)
    bn_beta = 0.1 * jax.random.normal(k_b, (C_out,), dtype=jnp.float32)
    bn_mean = 0.1 * jax.random.normal(k_m, (C_out,), dtype=jnp.float32)
    bn_var = 0.5 + jax.nn.sigmoid(jax.random.normal(k_v, (C_out,), dtype=jnp.float32))

    out = jax.block_until_ready(
        unit_skip_forward(x, conv_w, conv_b, bn_gamma, bn_beta, bn_mean, bn_var))

    # Tight check against the matched-precision reference (bf16 operands, f32 accumulation,
    # f32 bias) — validates the kernel's im2col / fold / fused-matmul logic.
    ref_bf16 = jax.block_until_ready(
        unit_skip_reference(x, conv_w, conv_b, bn_gamma, bn_beta, bn_mean, bn_var,
                            compute_dtype=jnp.bfloat16))
    np.testing.assert_allclose(np.asarray(out), np.asarray(ref_bf16), rtol=1e-4, atol=5e-4)

    # Loose check against the module's full-f32 math — only the bf16 rounding of x / folded
    # weights separates the two (f32 accumulation and f32 bias are shared).
    ref_f32 = jax.block_until_ready(
        unit_skip_reference(x, conv_w, conv_b, bn_gamma, bn_beta, bn_mean, bn_var,
                            compute_dtype=jnp.float32))
    np.testing.assert_allclose(np.asarray(out), np.asarray(ref_f32), rtol=5e-2, atol=5e-2)

    print("KERNEL_OK")
</pallas_src>

<mosaic_0001>
module attributes {stable_mosaic.version = 11 : i64} {
  func.func @_unit_skip_kernel(%arg0: i32, %arg1: i32, %arg2: memref<1x4x256xbf16, #tpu.memory_space<vmem>>, %arg3: memref<8x144xbf16, #tpu.memory_space<vmem>>, %arg4: memref<8x1xf32, #tpu.memory_space<vmem>>, %arg5: memref<1x8x256xf32, #tpu.memory_space<vmem>>, %arg6: memref<144x256xbf16, #tpu.memory_space<vmem>>) attributes {dimension_semantics = [#tpu.dimension_semantics<parallel>, #tpu.dimension_semantics<parallel>], iteration_bounds = array<i64: 2, 1>, scalar_prefetch = 0 : i64, scratch_operands = 1 : i64, tpu.core_type = #tpu.core_type<tc>, window_params = [{transform_indices = @transform_0, window_bounds = array<i64: 1, 4, 256>}, {transform_indices = @transform_1, window_bounds = array<i64: 8, 144>}, {transform_indices = @transform_2, window_bounds = array<i64: 8, 1>}, {transform_indices = @transform_3, window_bounds = array<i64: 1, 8, 256>}]} {
    %cst = arith.constant 0.000000e+00 : bf16
    %0 = vector.broadcast %cst : bf16 to vector<12x256xbf16>
    %c4 = arith.constant 4 : index
    %c0 = arith.constant 0 : index
    %1 = vector.load %arg6[%c4, %c0] : memref<144x256xbf16, #tpu.memory_space<vmem>>, vector<12x256xbf16>
    tpu.vector_store %arg6[%c4, %c0], %0 {strides = array<i32>} : memref<144x256xbf16, #tpu.memory_space<vmem>>, vector<12x256xbf16>,
    %cst_0 = arith.constant 0.000000e+00 : bf16
    %2 = vector.broadcast %cst_0 : bf16 to vector<12x256xbf16>
    %c20 = arith.constant 20 : index
    %c0_1 = arith.constant 0 : index
    %3 = vector.load %arg6[%c20, %c0_1] : memref<144x256xbf16, #tpu.memory_space<vmem>>, vector<12x256xbf16>
    tpu.vector_store %arg6[%c20, %c0_1], %2 {strides = array<i32>} : memref<144x256xbf16, #tpu.memory_space<vmem>>, vector<12x256xbf16>,
    %cst_2 = arith.constant 0.000000e+00 : bf16
    %4 = vector.broadcast %cst_2 : bf16 to vector<12x256xbf16>
    %c36 = arith.constant 36 : index
    %c0_3 = arith.constant 0 : index
    %5 = vector.load %arg6[%c36, %c0_3] : memref<144x256xbf16, #tpu.memory_space<vmem>>, vector<12x256xbf16>
    tpu.vector_store %arg6[%c36, %c0_3], %4 {strides = array<i32>} : memref<144x256xbf16, #tpu.memory_space<vmem>>, vector<12x256xbf16>,
    %cst_4 = arith.constant 0.000000e+00 : bf16
    %6 = vector.broadcast %cst_4 : bf16 to vector<12x256xbf16>
    %c52 = arith.constant 52 : index
    %c0_5 = arith.constant 0 : index
    %7 = vector.load %arg6[%c52, %c0_5] : memref<144x256xbf16, #tpu.memory_space<vmem>>, vector<12x256xbf16>
    tpu.vector_store %arg6[%c52, %c0_5], %6 {strides = array<i32>} : memref<144x256xbf16, #tpu.memory_space<vmem>>, vector<12x256xbf16>,
    %cst_6 = arith.constant 0.000000e+00 : bf16
    %8 = vector.broadcast %cst_6 : bf16 to vector<12x256xbf16>
    %c68 = arith.constant 68 : index
    %c0_7 = arith.constant 0 : index
    %9 = vector.load %arg6[%c68, %c0_7] : memref<144x256xbf16, #tpu.memory_space<vmem>>, vector<12x256xbf16>
    tpu.vector_store %arg6[%c68, %c0_7], %8 {strides = array<i32>} : memref<144x256xbf16, #tpu.memory_space<vmem>>, vector<12x256xbf16>,
    %cst_8 = arith.constant 0.000000e+00 : bf16
    %10 = vector.broadcast %cst_8 : bf16 to vector<12x256xbf16>
    %c84 = arith.constant 84 : index
    %c0_9 = arith.constant 0 : index
    %11 = vector.load %arg6[%c84, %c0_9] : memref<144x256xbf16, #tpu.memory_space<vmem>>, vector<12x256xbf16>
    tpu.vector_store %arg6[%c84, %c0_9], %10 {strides = array<i32>} : memref<144x256xbf16, #tpu.memory_space<vmem>>, vector<12x256xbf16>,
    %cst_10 = arith.constant 0.000000e+00 : bf16
    %12 = vector.broadcast %cst_10 : bf16 to vector<12x256xbf16>
    %c100 = arith.constant 100 : index
    %c0_11 = arith.constant 0 : index
    %13 = vector.load %arg6[%c100, %c0_11] : memref<144x256xbf16, #tpu.memory_space<vmem>>, vector<12x256xbf16>
    tpu.vector_store %arg6[%c100, %c0_11], %12 {strides = array<i32>} : memref<144x256xbf16, #tpu.memory_space<vmem>>, vector<12x256xbf16>,
    %cst_12 = arith.constant 0.000000e+00 : bf16
    %14 = vector.broadcast %cst_12 : bf16 to vector<12x256xbf16>
    %c116 = arith.constant 116 : index
    %c0_13 = arith.constant 0 : index
    %15 = vector.load %arg6[%c116, %c0_13] : memref<144x256xbf16, #tpu.memory_space<vmem>>, vector<12x256xbf16>
    tpu.vector_store %arg6[%c116, %c0_13], %14 {strides = array<i32>} : memref<144x256xbf16, #tpu.memory_space<vmem>>, vector<12x256xbf16>,
    %cst_14 = arith.constant 0.000000e+00 : bf16
    %16 = vector.broadcast %cst_14 : bf16 to vector<12x256xbf16>
    %c132 = arith.constant 132 : index
    %c0_15 = arith.constant 0 : index
    %17 = vector.load %arg6[%c132, %c0_15] : memref<144x256xbf16, #tpu.memory_space<vmem>>, vector<12x256xbf16>
    tpu.vector_store %arg6[%c132, %c0_15], %16 {strides = array<i32>} : memref<144x256xbf16, #tpu.memory_space<vmem>>, vector<12x256xbf16>,
    %cst_16 = arith.constant 0.000000e+00 : bf16
    %18 = vector.broadcast %cst_16 : bf16 to vector<4x64xbf16>
    %c0_17 = arith.constant 0 : index
    %c0_18 = arith.constant 0 : index
    %19 = vector.load %arg6[%c0_17, %c0_18] : memref<144x256xbf16, #tpu.memory_space<vmem>>, vector<4x64xbf16>
    tpu.vector_store %arg6[%c0_17, %c0_18], %18 {strides = array<i32>} : memref<144x256xbf16, #tpu.memory_space<vmem>>, vector<4x64xbf16>,
    %c0_19 = arith.constant 0 : index
    %c0_20 = arith.constant 0 : index
    %c0_21 = arith.constant 0 : index
    %20 = vector.load %arg2[%c0_19, %c0_20, %c0_21] : memref<1x4x256xbf16, #tpu.memory_space<vmem>>, vector<1x4x192xbf16>
    %21 = vector.shape_cast %20 : vector<1x4x192xbf16> to vector<4x192xbf16>
    %c0_22 = arith.constant 0 : index
    %c64 = arith.constant 64 : index
    %22 = vector.load %arg6[%c0_22, %c64] : memref<144x256xbf16, #tpu.memory_space<vmem>>, vector<4x192xbf16>
    tpu.vector_store %arg6[%c0_22, %c64], %21 {strides = array<i32>} : memref<144x256xbf16, #tpu.memory_space<vmem>>, vector<4x192xbf16>,
    %cst_23 = arith.constant 0.000000e+00 : bf16
    %23 = vector.broadcast %cst_23 : bf16 to vector<4x48xbf16>
    %c16 = arith.constant 16 : index
    %c0_24 = arith.constant 0 : index
    %24 = vector.load %arg6[%c16, %c0_24] : memref<144x256xbf16, #tpu.memory_space<vmem>>, vector<4x48xbf16>
    tpu.vector_store %arg6[%c16, %c0_24], %23 {strides = array<i32>} : memref<144x256xbf16, #tpu.memory_space<vmem>>, vector<4x48xbf16>,
    %c0_25 = arith.constant 0 : index
    %c0_26 = arith.constant 0 : index
    %c0_27 = arith.constant 0 : index
    %25 = vector.load %arg2[%c0_25, %c0_26, %c0_27] : memref<1x4x256xbf16, #tpu.memory_space<vmem>>, vector<1x4x208xbf16>
    %26 = vector.shape_cast %25 : vector<1x4x208xbf16> to vector<4x208xbf16>
    %c16_28 = arith.constant 16 : index
    %c48 = arith.constant 48 : index
    %27 = vector.load %arg6[%c16_28, %c48] : memref<144x256xbf16, #tpu.memory_space<vmem>>, vector<4x208xbf16>
    tpu.vector_store %arg6[%c16_28, %c48], %26 {strides = array<i32>} : memref<144x256xbf16, #tpu.memory_space<vmem>>, vector<4x208xbf16>,
    %cst_29 = arith.constant 0.000000e+00 : bf16
    %28 = vector.broadcast %cst_29 : bf16 to vector<4x32xbf16>
    %c32 = arith.constant 32 : index
    %c0_30 = arith.constant 0 : index
    %29 = vector.load %arg6[%c32, %c0_30] : memref<144x256xbf16, #tpu.memory_space<vmem>>, vector<4x32xbf16>
    tpu.vector_store %arg6[%c32, %c0_30], %28 {strides = array<i32>} : memref<144x256xbf16, #tpu.memory_space<vmem>>, vector<4x32xbf16>,
    %c0_31 = arith.constant 0 : index
    %c0_32 = arith.constant 0 : index
    %c0_33 = arith.constant 0 : index
    %30 = vector.load %arg2[%c0_31, %c0_32, %c0_33] : memref<1x4x256xbf16, #tpu.memory_space<vmem>>, vector<1x4x224xbf16>
    %31 = vector.shape_cast %30 : vector<1x4x224xbf16> to vector<4x224xbf16>
    %c32_34 = arith.constant 32 : index
    %c32_35 = arith.constant 32 : index
    %32 = vector.load %arg6[%c32_34, %c32_35] : memref<144x256xbf16, #tpu.memory_space<vmem>>, vector<4x224xbf16>
    tpu.vector_store %arg6[%c32_34, %c32_35], %31 {strides = array<i32>} : memref<144x256xbf16, #tpu.memory_space<vmem>>, vector<4x224xbf16>,
    %cst_36 = arith.constant 0.000000e+00 : bf16
    %33 = vector.broadcast %cst_36 : bf16 to vector<4x16xbf16>
    %c48_37 = arith.constant 48 : index
    %c0_38 = arith.constant 0 : index
    %34 = vector.load %arg6[%c48_37, %c0_38] : memref<144x256xbf16, #tpu.memory_space<vmem>>, vector<4x16xbf16>
    tpu.vector_store %arg6[%c48_37, %c0_38], %33 {strides = array<i32>} : memref<144x256xbf16, #tpu.memory_space<vmem>>, vector<4x16xbf16>,
    %c0_39 = arith.constant 0 : index
    %c0_40 = arith.constant 0 : index
    %c0_41 = arith.constant 0 : index
    %35 = vector.load %arg2[%c0_39, %c0_40, %c0_41] : memref<1x4x256xbf16, #tpu.memory_space<vmem>>, vector<1x4x240xbf16>
    %36 = vector.shape_cast %35 : vector<1x4x240xbf16> to vector<4x240xbf16>
    %c48_42 = arith.constant 48 : index
    %c16_43 = arith.constant 16 : index
    %37 = vector.load %arg6[%c48_42, %c16_43] : memref<144x256xbf16, #tpu.memory_space<vmem>>, vector<4x240xbf16>
    tpu.vector_store %arg6[%c48_42, %c16_43], %36 {strides = array<i32>} : memref<144x256xbf16, #tpu.memory_space<vmem>>, vector<4x240xbf16>,
    %c0_44 = arith.constant 0 : index
    %c0_45 = arith.constant 0 : index
    %c0_46 = arith.constant 0 : index
    %38 = vector.load %arg2[%c0_44, %c0_45, %c0_46] : memref<1x4x256xbf16, #tpu.memory_space<vmem>>, vector<1x4x256xbf16>
    %39 = vector.shape_cast %38 : vector<1x4x256xbf16> to vector<4x256xbf16>
    %c64_47 = arith.constant 64 : index
    %c0_48 = arith.constant 0 : index
    %40 = vector.load %arg6[%c64_47, %c0_48] : memref<144x256xbf16, #tpu.memory_space<vmem>>, vector<4x256xbf16>
    tpu.vector_store %arg6[%c64_47, %c0_48], %39 {strides = array<i32>} : memref<144x256xbf16, #tpu.memory_space<vmem>>, vector<4x256xbf16>,
    %cst_49 = arith.constant 0.000000e+00 : bf16
    %41 = vector.broadcast %cst_49 : bf16 to vector<4x16xbf16>
    %c80 = arith.constant 80 : index
    %c240 = arith.constant 240 : index
    %42 = vector.load %arg6[%c80, %c240] : memref<144x256xbf16, #tpu.memory_space<vmem>>, vector<4x16xbf16>
    tpu.vector_store %arg6[%c80, %c240], %41 {strides = array<i32>} : memref<144x256xbf16, #tpu.memory_space<vmem>>, vector<4x16xbf16>,
    %c0_50 = arith.constant 0 : index
    %c0_51 = arith.constant 0 : index
    %c16_52 = arith.constant 16 : index
    %43 = vector.load %arg2[%c0_50, %c0_51, %c16_52] : memref<1x4x256xbf16, #tpu.memory_space<vmem>>, vector<1x4x240xbf16>
    %44 = vector.shape_cast %43 : vector<1x4x240xbf16> to vector<4x240xbf16>
    %c80_53 = arith.constant 80 : index
    %c0_54 = arith.constant 0 : index
    %45 = vector.load %arg6[%c80_53, %c0_54] : memref<144x256xbf16, #tpu.memory_space<vmem>>, vector<4x240xbf16>
    tpu.vector_store %arg6[%c80_53, %c0_54], %44 {strides = array<i32>} : memref<144x256xbf16, #tpu.memory_space<vmem>>, vector<4x240xbf16>,
    %cst_55 = arith.constant 0.000000e+00 : bf16
    %46 = vector.broadcast %cst_55 : bf16 to vector<4x32xbf16>
    %c96 = arith.constant 96 : index
    %c224 = arith.constant 224 : index
    %47 = vector.load %arg6[%c96, %c224] : memref<144x256xbf16, #tpu.memory_space<vmem>>, vector<4x32xbf16>
    tpu.vector_store %arg6[%c96, %c224], %46 {strides = array<i32>} : memref<144x256xbf16, #tpu.memory_space<vmem>>, vector<4x32xbf16>,
    %c0_56 = arith.constant 0 : index
    %c0_57 = arith.constant 0 : index
    %c32_58 = arith.constant 32 : index
    %48 = vector.load %arg2[%c0_56, %c0_57, %c32_58] : memref<1x4x256xbf16, #tpu.memory_space<vmem>>, vector<1x4x224xbf16>
    %49 = vector.shape_cast %48 : vector<1x4x224xbf16> to vector<4x224xbf16>
    %c96_59 = arith.constant 96 : index
    %c0_60 = arith.constant 0 : index
    %50 = vector.load %arg6[%c96_59, %c0_60] : memref<144x256xbf16, #tpu.memory_space<vmem>>, vector<4x224xbf16>
    tpu.vector_store %arg6[%c96_59, %c0_60], %49 {strides = array<i32>} : memref<144x256xbf16, #tpu.memory_space<vmem>>, vector<4x224xbf16>,
    %cst_61 = arith.constant 0.000000e+00 : bf16
    %51 = vector.broadcast %cst_61 : bf16 to vector<4x48xbf16>
    %c112 = arith.constant 112 : index
    %c208 = arith.constant 208 : index
    %52 = vector.load %arg6[%c112, %c208] : memref<144x256xbf16, #tpu.memory_space<vmem>>, vector<4x48xbf16>
    tpu.vector_store %arg6[%c112, %c208], %51 {strides = array<i32>} : memref<144x256xbf16, #tpu.memory_space<vmem>>, vector<4x48xbf16>,
    %c0_62 = arith.constant 0 : index
    %c0_63 = arith.constant 0 : index
    %c48_64 = arith.constant 48 : index
    %53 = vector.load %arg2[%c0_62, %c0_63, %c48_64] : memref<1x4x256xbf16, #tpu.memory_space<vmem>>, vector<1x4x208xbf16>
    %54 = vector.shape_cast %53 : vector<1x4x208xbf16> to vector<4x208xbf16>
    %c112_65 = arith.constant 112 : index
    %c0_66 = arith.constant 0 : index
    %55 = vector.load %arg6[%c112_65, %c0_66] : memref<144x256xbf16, #tpu.memory_space<vmem>>, vector<4x208xbf16>
    tpu.vector_store %arg6[%c112_65, %c0_66], %54 {strides = array<i32>} : memref<144x256xbf16, #tpu.memory_space<vmem>>, vector<4x208xbf16>,
    %cst_67 = arith.constant 0.000000e+00 : bf16
    %56 = vector.broadcast %cst_67 : bf16 to vector<4x64xbf16>
    %c128 = arith.constant 128 : index
    %c192 = arith.constant 192 : index
    %57 = vector.load %arg6[%c128, %c192] : memref<144x256xbf16, #tpu.memory_space<vmem>>, vector<4x64xbf16>
    tpu.vector_store %arg6[%c128, %c192], %56 {strides = array<i32>} : memref<144x256xbf16, #tpu.memory_space<vmem>>, vector<4x64xbf16>,
    %c0_68 = arith.constant 0 : index
    %c0_69 = arith.constant 0 : index
    %c64_70 = arith.constant 64 : index
    %58 = vector.load %arg2[%c0_68, %c0_69, %c64_70] : memref<1x4x256xbf16, #tpu.memory_space<vmem>>, vector<1x4x192xbf16>
    %59 = vector.shape_cast %58 : vector<1x4x192xbf16> to vector<4x192xbf16>
    %c128_71 = arith.constant 128 : index
    %c0_72 = arith.constant 0 : index
    %60 = vector.load %arg6[%c128_71, %c0_72] : memref<144x256xbf16, #tpu.memory_space<vmem>>, vector<4x192xbf16>
    tpu.vector_store %arg6[%c128_71, %c0_72], %59 {strides = array<i32>} : memref<144x256xbf16, #tpu.memory_space<vmem>>, vector<4x192xbf16>,
    %c0_73 = arith.constant 0 : index
    %c0_74 = arith.constant 0 : index
    %61 = vector.load %arg3[%c0_73, %c0_74] : memref<8x144xbf16, #tpu.memory_space<vmem>>, vector<8x144xbf16>
    %c0_75 = arith.constant 0 : index
    %c0_76 = arith.constant 0 : index
    %62 = vector.load %arg6[%c0_75, %c0_76] : memref<144x256xbf16, #tpu.memory_space<vmem>>, vector<144x256xbf16>
    %cst_77 = arith.constant dense<0.000000e+00> : vector<8x256xf32>
    %63 = tpu.matmul %61, %62, %cst_77 {dimension_numbers = #tpu.dot_dimension_numbers<[1], [0], [0], [1], [0, 0, 1, 1], [], []>} : vector<8x144xbf16>, vector<144x256xbf16>, vector<8x256xf32> -> vector<8x256xf32>
    %c0_78 = arith.constant 0 : index
    %c0_79 = arith.constant 0 : index
    %64 = vector.load %arg4[%c0_78, %c0_79] : memref<8x1xf32, #tpu.memory_space<vmem>>, vector<8x1xf32>
    %65 = vector.broadcast %64 : vector<8x1xf32> to vector<8x256xf32>
    %66 = arith.addf %63, %65 : vector<8x256xf32>
    %c0_80 = arith.constant 0 : index
    %c0_81 = arith.constant 0 : index
    %c0_82 = arith.constant 0 : index
    %67 = vector.load %arg5[%c0_80, %c0_81, %c0_82] : memref<1x8x256xf32, #tpu.memory_space<vmem>>, vector<1x8x256xf32>
    %68 = vector.shape_cast %67 : vector<1x8x256xf32> to vector<8x256xf32>
    %69 = vector.shape_cast %66 : vector<8x256xf32> to vector<1x8x256xf32>
    tpu.vector_store %arg5[%c0_80, %c0_81, %c0_82], %69 {strides = array<i32>} : memref<1x8x256xf32, #tpu.memory_space<vmem>>, vector<1x8x256xf32>,
    return
  }
  func.func @transform_0(%arg0: i32, %arg1: i32) -> (i32, i32, i32) {
    %c0_i32 = arith.constant 0 : i32
    %c0_i32_0 = arith.constant 0 : i32
    %c0_i32_1 = arith.constant 0 : i32
    return %arg0, %c0_i32, %c0_i32_0 : i32, i32, i32
  }
  func.func @transform_1(%arg0: i32, %arg1: i32) -> (i32, i32) {
    %c0_i32 = arith.constant 0 : i32
    %c0_i32_0 = arith.constant 0 : i32
    return %arg1, %c0_i32 : i32, i32
  }
  func.func @transform_2(%arg0: i32, %arg1: i32) -> (i32, i32) {
    %c0_i32 = arith.constant 0 : i32
    %c0_i32_0 = arith.constant 0 : i32
    return %arg1, %c0_i32 : i32, i32
  }
  func.func @transform_3(%arg0: i32, %arg1: i32) -> (i32, i32, i32) {
    %c0_i32 = arith.constant 0 : i32
    %c0_i32_0 = arith.constant 0 : i32
    return %arg0, %arg1, %c0_i32 : i32, i32, i32
  }
}

</mosaic_0001>

<bundles_post_ra>
// kernel: tpu_custom_call.1
= control target key start
LH: loop header
LB: loop body
LE: loop exit
PB: predicated region body
PF: predicated region fallthrough
CT: control target
= control target key end

     0   :  { %8 = vsyncpa [#allocation4], 0  ;;  %s1047_s0 = inlined_call_operand.vmem [shape: bf16[2,4,256], index: 0, kind: input, shape index: {}]   ;;  %s1048_s1 = inlined_call_operand.hbm [shape: bf16[8,144], index: 1, kind: input, shape index: {}]   ;;  %s1049_s2 = inlined_call_operand.vmem [shape: f32[8,1], index: 2, kind: input, shape index: {}]   ;;  %s1050_s3 = inlined_call_operand.hbm [shape: f32[2,8,256], index: 3, kind: output, shape index: {}]  }
   0x1   :  { %9 = vsyncpa [#allocation5], 0 }
   0x2   :  { %11 = vsyncpa [#allocation5 + $0x1], 0  ;;  %s878_s12 = smov 0   ;;  %s880_s13 = smov 0  }
   0x3   :  { %s882_s14 = smov 0   ;;  %s884_s15 = smov 0  }
   0x4   :  { %s886_s16 = smov 0   ;;  %s888_s17 = smov 0  }
   0x5 LB: > { %s629_s18 = sadd.s32 4294967295, %s846_s17   ;;  %s630_s19 = sadd.s32 4294967294, %s846_s17   ;;  %s846_s17 = sphi %s888_s17, %s17_s17   ;;  %s842_s16 = sphi %s886_s16, %s1068_s16   ;;  %s838_s15 = sphi %s884_s15, %s1067_s15   ;;  %s834_s14 = sphi %s882_s14, %s1066_s14   ;;  %s830_s13 = sphi %s880_s13, %s1065_s13   ;;  %s826_s12 = sphi %s878_s12, %s1064_s12  }
   0x6   : > { %s29_s20 = sadd.s32 1, %s842_s16  ;;  %s116_s21 = sadd.s32 1, %s834_s14 }
   0x7   : > { %p31_p0 = scmp.ge.s32.totalorder %s29_s20, 2  ;;  %p126_p1 = scmp.ne.s32.totalorder %s834_s14, %s830_s13 }
   0x8   : > { %p127_p2 = scmp.eq.s32.totalorder %s629_s18, 1  ;;  %p132_p3 = scmp.ne.s32.totalorder %s830_s13, %s826_s12 }
   0x9   : > { %s1070_s20 = smov (%p31_p0, %s29_s20), 0  ;;  %p133_p5 = scmp.eq.s32.totalorder %s630_s19, 1 }
   0xa   : > { %p918_p4 = por %p127_p2, %p126_p1  ;;  %s111_s23 = ssub.s32 %s842_s16, %s1070_s20 }
   0xb   : > { %p631_p6 = scmp.ge.s32.totalorder %s846_s17, 1  ;;  %p114_p7 = scmp.eq.s32.totalorder %s111_s23, 0 }
   0xc   : > { %s1055_s22 = scalar_select %p918_p4, 1, 0 }
   0xd   : > { %p925_p8 = por %p133_p5, %p132_p3  ;;  %p140_p9 = scmp.lt.s32.totalorder %s846_s17, 3 }
   0xe   : > { %s931_s25 = scalar_select %p114_p7, %s834_s14, %s116_s21  }
   0xf   : > { %s1056_s24 = scalar_select %p925_p8, 1, 0 }
  0x10   : > { %p933_p10 = pnand %p631_p6, %p140_p9  ;;  %p937_p11 = scmp.eq.s32.totalorder %s629_s18, 0 }
  0x11   : > { %s848_s28 = smov [#allocation3]   ;;  %s736_s6 = scalar_lea.hbm %s1048_s1, 128 }
  0x12   : > { %s1057_s26 = scalar_select %p933_p10, 1, 0 }
  0x13   : > { %s1058_s27 = scalar_select %p937_p11, 1, 0 }
  0x14   : > { %p665_p12 = pneg %p933_p10  ;;  %s156_s29 = sshll.u32 %s848_s28, 4  ;;  %s157_s29 = int_to_ptr.vmem [resolvable:$true] %s156_s29 }
  0x15   : > { %p737_p0 = scmp.ne.s32.totalorder %s1048_s1, %s736_s6  ;;  %p743_p5 = scmp.lt.u32.totalorder %s736_s6, %s1048_s1 }
  0x16   : > { %p945_p13 = pnand %p937_p11, %p665_p12 }
  0x18   : > { %p738_p1 = pneg %p945_p13 }
  0x1a   : > { %p739_p2 = pnand %p738_p1, %p737_p0 }
  0x1c   : > { %p740_p3 = pneg %p739_p2 }
  0x1e   : > { %p745_p6 = pnand %p743_p5, %p740_p3 }
  0x20   : > { %748 = shalt.err (!%p745_p6)
}
  0x21   : > { %s749_s11 = scalar_lea.vmem %s157_s29, 128  ;;  %p757_p8 = scmp.lt.s32.totalorder %s157_s29, %s157_s29 }
  0x22   : > { %p750_p7 = scmp.ne.s32.totalorder %s157_s29, %s749_s11  ;;  %p758_p4 = scmp.lt.s32.totalorder %s749_s11, %s749_s11 }
  0x24   : > { %p752_p9 = pnand %p750_p7, %p738_p1  ;;  %p759_p11 = por %p758_p4, %p757_p8 }
  0x26   : > { %p753_p12 = pneg %p752_p9 }
  0x28   : > { %p760_p10 = pnand %p759_p11, %p753_p12 }
  0x2a   : > { %763 = shalt.err (!%p760_p10)
}
  0x2b   : > { %668 = dma.hbm_to_vmem [thread:$0]  (!%p945_p13), %s1048_s1, 128, %s157_s29, [#allocation4]  }
  0x2c   : > { %p1060_p0 = scmp.ne.s32.totalorder %s1057_s26, 0 }
  0x2d   : > { %p1061_p2 = scmp.ne.s32.totalorder (!%p1060_p0), %s1058_s27, 0 }
  0x2e   : > { %184 = sbr.rel (%p1060_p0) target bundleno = 459 (0x1cb), region = 32 }
  0x35   : > { %817 = dma.done.wait (%p1061_p2), [#allocation4], 128  }
  0x36   : > { %819 = vsyncadd (%p1061_p2), [#allocation4], 4294967168  ;;  %p212_p1 = scmp.lt.s32.totalorder %s838_s15, 1  ;;  %vm263_vm0 = vcmask 386048   ;;  %v849_v0 = vmov 0   ;;  %vm240_vm1 = vcmask 517120  }
  0x37   : > { %264 = vst.msk [vmem:[#allocation2 + $0x10] sm:$0x3] %vm263_vm0, %v849_v0  ;;  %222 = vst [vmem:[#allocation2] sm:$0xfc] %v849_v0  ;;  %vm260_vm2 = vcmask 1041920   ;;  %733 = vset.pattern.permute.xlu0 %v849_v0  ;;  %vm286_vm3 = vcmask 254976  }
  0x38   : > { %223 = vst [vmem:[#allocation2 + $0x8] sm:$0xfc] %v849_v0  ;;  %224 = vst [vmem:[#allocation2 + $0x10] sm:$0xfc] %v849_v0  ;;  %s213_s21 = scalar_select %p212_p1, %s838_s15, 1  ;;  %vm309_vm4 = vcmask 123904  }
  0x39   : > { %225 = vst [vmem:[#allocation2 + $0x18] sm:$0xfc] %v849_v0  ;;  %226 = vst [vmem:[#allocation2 + $0x20] sm:$0xfc] %v849_v0  ;;  %s850_s29 = smov 48   ;;  %s851_s30 = smov 64  }
  0x3a   : > { %227 = vst [vmem:[#allocation2 + $0x28] sm:$0xfc] %v849_v0  ;;  %228 = vst [vmem:[#allocation2 + $0x30] sm:$0xfc] %v849_v0  ;;  %s657_s23 = sshll.u32 %s213_s21, 2  ;;  %s852_s4 = smov 32  }
  0x3b   : > { %229 = vst [vmem:[#allocation2 + $0x38] sm:$0xfc] %v849_v0  ;;  %230 = vst [vmem:[#allocation2 + $0x40] sm:$0xfc] %v849_v0  ;;  %s216_s28 = scalar_lea.vmem %s1047_s0, %s657_s23  ;;  %vm346_vm5 = vcmask 1042304   ;;  %s853_s5 = smov 16  }
  0x3c   : > { %231 = vst [vmem:[#allocation2 + $0x48] sm:$0xfc] %v849_v0  ;;  %232 = vst [vmem:[#allocation2 + $0x50] sm:$0xfc] %v849_v0  ;;  %vm369_vm6 = vcmask 1042176   ;;  %s854_s6 = smov 112  }
  0x3d   : > { %233 = vst [vmem:[#allocation2 + $0x58] sm:$0xfc] %v849_v0  ;;  %234 = vst [vmem:[#allocation2 + $0x60] sm:$0xfc] %v849_v0  ;;  %vm392_vm7 = vcmask 1042048   ;;  %s855_s7 = smov 96  }
  0x3e   : > { %235 = vst [vmem:[#allocation2 + $0x68] sm:$0xfc] %v849_v0  ;;  %236 = vst [vmem:[#allocation2 + $0x70] sm:$0xfc] %v849_v0  ;;  %s856_s8 = smov 80   ;;  %v980_v3 = vld [vmem:[#allocation3] sm:$0xff] }
  0x3f   : > { %237 = vst [vmem:[#allocation2 + $0x78] sm:$0xfc] %v849_v0  ;;  %238 = vst [vmem:[#allocation2 + $0x80] sm:$0xfc] %v849_v0  ;;  %v650_v4 = vcombine.high %v980_v3, %v980_v3  ;;  %vm325_vm8 = vcmask 130048   ;;  %v454_v5 = vld [vmem:[%s1049_s2] sm:$0xff]  ;;  %v649_v48 = vcombine.low %v980_v3, %v980_v3 }
  0x40   : > { %239 = vst [vmem:[#allocation2 + $0x88] sm:$0xfc] %v849_v0  ;;  %241 = vst.msk [vmem:[#allocation2] sm:$0x3] %vm240_vm1, %v849_v0  ;;  %vm283_vm9 = vcmask 1041792   ;;  %vm279_vm10 = vcmask 392192  }
  0x41   : > { %415 = vst.msk [vmem:[#allocation2 + $0x88] sm:$0x3] %vm260_vm2, %v849_v0  ;;  %v641_v1 = vld.sshfl [vmem:[%s216_s28] sm:$0x33 pattern:$0x76325410]  ;;  %651 = vmatprep.mubr.msk.bf16.mxu0 %vm325_vm8, %v650_v4 }
  0x42   : > { %287 = vst.msk [vmem:[#allocation2 + $0x20] sm:$0x3] %vm286_vm3, %v849_v0  ;;  %275 = vrot.lane.b32.xlu1 %v641_v1, %s850_s29  ;;  %v274_v2 = vcombine.high %v641_v1, %v641_v1  ;;  %252 = vrot.lane.b32.xlu0 %v641_v1, %s851_s30  ;;  %344 = vst [vmem:[#allocation2 + $0x40] sm:$0x3] %v641_v1  ;;  %vm256_vm11 = vcmask 523264   ;;  %vm302_vm12 = vcmask 261120  }
  0x43   : > { %310 = vst.msk [vmem:[#allocation2 + $0x30] sm:$0x3] %vm309_vm4, %v849_v0  ;;  %vm306_vm13 = vcmask 1041664   ;;  %vm329_vm14 = vcmask 1041536   ;;  %vm367_vm15 = vcmask 910336   ;;  %vm362_vm0 = vcmask 916480  }
  0x44   : > { %345 = vst [vmem:[#allocation2 + $0x48] sm:$0x3] %v274_v2  ;;  %347 = vst.msk [vmem:[#allocation2 + $0x58] sm:$0x3] %vm346_vm5, %v849_v0  ;;  %vm385_vm3 = vcmask 785408   ;;  %vm413_vm4 = vcmask 648192  }
  0x45   : > { %370 = vst.msk [vmem:[#allocation2 + $0x68] sm:$0x3] %vm369_vm6, %v849_v0  ;;  %vm408_vm5 = vcmask 654336   ;;  %s209_s11 = sand.u32 1, %s830_s13   ;;  %s658_s19 = sshll.u32 %s838_s15, 8 }
  0x46   : > { %277 = vrot.lane.b32.xlu1 %v274_v2, %s850_s29  ;;  %254 = vrot.lane.b32.xlu0 %v274_v2, %s851_s30  ;;  %393 = vst.msk [vmem:[#allocation2 + $0x78] sm:$0x3] %vm392_vm7, %v849_v0  ;;  %s637_s18 = sshll.u32 %s209_s11, 4  ;;  %s1000_s28 = scalar_lea.hbm %s1050_s3, %s658_s19 }
  0x47   : > { %s211_s21 = scalar_lea.vmem [#allocation6], %s637_s18  ;;  %s514_s15 = scalar_lea.sflag [#allocation5], %s209_s11 }
  0x48   : > { %s530_s23 = sshll.u32 %s211_s21, 4  ;;  %p1062_p8 = scmp.ne.s32.totalorder %s1055_s22, 0  ;;  %s1002_s23 = int_to_ptr.vmem [resolvable:$true] %s530_s23 }
  0x49   : > { %v444_v36 = vld [vmem:[#allocation2 + $0x40] sm:$0xff]  ;;  %s764_s29 = scalar_lea.vmem %s1002_s23, 256 }
  0x4a   : > { %300 = vrot.lane.b32.xlu1 %v274_v2, %s852_s4  ;;  %298 = vrot.lane.b32.xlu0 %v641_v1, %s852_s4  ;;  %p765_p4 = scmp.ne.s32.totalorder %s1002_s23, %s764_s29 }
  0x4b   : > { %v445_v33 = vld [vmem:[#allocation2 + $0x48] sm:$0xff] }
  0x4c   : > { %p766_p10 = pnand %p765_p4, %p1062_p8 }
  0x4e   : > { %323 = vrot.lane.b32.xlu1 %v274_v2, %s853_s5  ;;  %321 = vrot.lane.b32.xlu0 %v641_v1, %s853_s5  ;;  %p767_p11 = pneg %p766_p10 }
  0x52   : > { %360 = vrot.lane.b32.xlu1 %v274_v2, %s854_s6  ;;  %358 = vrot.lane.b32.xlu0 %v641_v1, %s854_s6 }
  0x56   : > { %383 = vrot.lane.b32.xlu1 %v274_v2, %s855_s7  ;;  %381 = vrot.lane.b32.xlu0 %v641_v1, %s855_s7 }
  0x5a   : > { %406 = vrot.lane.b32.xlu1 %v274_v2, %s856_s8  ;;  %404 = vrot.lane.b32.xlu0 %v641_v1, %s856_s8 }
  0x5e   : > { %428 = vrot.lane.b32.xlu1 %v274_v2, %s851_s30  ;;  %426 = vrot.lane.b32.xlu0 %v641_v1, %s851_s30  ;;  %s857_s30 = smov [#allocation6]  }
  0x5f   : > { %s768_s4 = sshll.u32 %s857_s30, 4  ;;  %s769_s4 = int_to_ptr.vmem [resolvable:$false] %s768_s4 }
  0x60   : > { %s770_s5 = scalar_lea.vmem %s769_s4, 512  ;;  %p771_p13 = scmp.lt.s32.totalorder %s1002_s23, %s769_s4 }
  0x61   : > { %p772_p3 = scmp.lt.s32.totalorder %s770_s5, %s764_s29 }
  0x62   : > { %457 = vperm.xlu0 %733, %v454_v5  }
  0x63   : > { %p773_p5 = por %p772_p3, %p771_p13 }
  0x65   : > { %p774_p6 = pnand %p773_p5, %p767_p11 }
  0xb4   : > { %v276_v6 = vpop.permute.xlu1 %275  ;;  %v253_v7 = vpop.permute.xlu0 %252 }
  0xb5   : > { %284 = vst.msk [vmem:[#allocation2 + $0x10] sm:$0x3] %vm283_vm9, %v276_v6 }
  0xb6   : > { %261 = vst.msk [vmem:[#allocation2] sm:$0x3] %vm260_vm2, %v253_v7  ;;  %vm390_vm2 = vcmask 779264  }
  0xb8   : > { %v278_v8 = vpop.permute.xlu1 %277  ;;  %v255_v9 = vpop.permute.xlu0 %254 }
  0xb9   : > { %v280_v10 = vsel %vm279_vm10, %v276_v6, %v278_v8  ;;  %v257_v11 = vsel %vm256_vm11, %v253_v7, %v255_v9 }
  0xba   : > { %285 = vst [vmem:[#allocation2 + $0x18] sm:$0x3] %v280_v10  ;;  %262 = vst [vmem:[#allocation2 + $0x8] sm:$0x3] %v257_v11 }
  0xbc   : > { %v301_v12 = vpop.permute.xlu1 %300  ;;  %v299_v13 = vpop.permute.xlu0 %298  ;;  %v438_v25 = vld [vmem:[#allocation2 + $0x10] sm:$0xff] }
  0xbd   : > { %v303_v14 = vsel %vm302_vm12, %v299_v13, %v301_v12  ;;  %307 = vst.msk [vmem:[#allocation2 + $0x20] sm:$0x3] %vm306_vm13, %v299_v13  ;;  %v436_v19 = vld [vmem:[#allocation2] sm:$0xff] }
  0xbe   : > { %308 = vst [vmem:[#allocation2 + $0x28] sm:$0x3] %v303_v14 }
  0xc0   : > { %v324_v15 = vpop.permute.xlu1 %323  ;;  %v322_v16 = vpop.permute.xlu0 %321 }
  0xc1   : > { %v437_v17 = vld [vmem:[#allocation2 + $0x8] sm:$0xff]  ;;  %v326_v18 = vsel %vm325_vm8, %v322_v16, %v324_v15  ;;  %330 = vst.msk [vmem:[#allocation2 + $0x30] sm:$0x3] %vm329_vm14, %v322_v16  ;;  %v439_v20 = vld [vmem:[#allocation2 + $0x18] sm:$0xff] }
  0xc2   : > { %470 = vmatprep.subr.bf16.mxu0 %v437_v17  ;;  %331 = vst [vmem:[#allocation2 + $0x38] sm:$0x3] %v326_v18 }
  0xc3   : > { %471 = vmatpush1.bf16.msra.mxu0 %v436_v19 }
  0xc4   : > { %472 = vmatprep.subr.bf16.mxu0 %v439_v20  ;;  %v361_v21 = vpop.permute.xlu1 %360  ;;  %v359_v22 = vpop.permute.xlu0 %358  ;;  %v440_v30 = vld [vmem:[#allocation2 + $0x20] sm:$0xff] }
  0xc5   : > { %v441_v23 = vld [vmem:[#allocation2 + $0x28] sm:$0xff]  ;;  %368 = vst.msk [vmem:[#allocation2 + $0x58] sm:$0x3] %vm367_vm15, %v361_v21  ;;  %v363_v24 = vsel %vm362_vm0, %v359_v22, %v361_v21 }
  0xc6   : > { %366 = vst [vmem:[#allocation2 + $0x50] sm:$0x3] %v363_v24 }
  0xc7   : > { %473 = vmatpush1.bf16.msra.mxu0 %v438_v25 }
  0xc8   : > { %474 = vmatprep.subr.bf16.mxu0 %v441_v23  ;;  %v384_v26 = vpop.permute.xlu1 %383  ;;  %v382_v27 = vpop.permute.xlu0 %381  ;;  %v442_v35 = vld [vmem:[#allocation2 + $0x30] sm:$0xff] }
  0xc9   : > { %v443_v28 = vld [vmem:[#allocation2 + $0x38] sm:$0xff]  ;;  %391 = vst.msk [vmem:[#allocation2 + $0x68] sm:$0x3] %vm390_vm2, %v384_v26  ;;  %v386_v29 = vsel %vm385_vm3, %v382_v27, %v384_v26 }
  0xca   : > { %389 = vst [vmem:[#allocation2 + $0x60] sm:$0x3] %v386_v29 }
  0xcb   : > { %475 = vmatpush1.bf16.msra.mxu0 %v440_v30 }
  0xcc   : > { %476 = vmatprep.subr.bf16.mxu0 %v443_v28  ;;  %v407_v31 = vpop.permute.xlu1 %406  ;;  %v405_v32 = vpop.permute.xlu0 %404  ;;  %v447_v39 = vld [vmem:[#allocation2 + $0x58] sm:$0xff] }
  0xcd   : > { %414 = vst.msk [vmem:[#allocation2 + $0x78] sm:$0x3] %vm413_vm4, %v407_v31  ;;  %v409_v34 = vsel %vm408_vm5, %v405_v32, %v407_v31  ;;  %v446_v41 = vld [vmem:[#allocation2 + $0x50] sm:$0xff] }
  0xce   : > { %412 = vst [vmem:[#allocation2 + $0x70] sm:$0x3] %v409_v34 }
  0xcf   : > { %477 = vmatpush1.bf16.msra.mxu0 %v442_v35 }
  0xd0   : > { %478 = vmatprep.subr.bf16.mxu0 %v445_v33  ;;  %v429_v37 = vpop.permute.xlu1 %428  ;;  %v427_v38 = vpop.permute.xlu0 %426  ;;  %v449_v42 = vld [vmem:[#allocation2 + $0x68] sm:$0xff] }
  0xd1   : > { %434 = vst.msk [vmem:[#allocation2 + $0x88] sm:$0x3] %vm240_vm1, %v429_v37  ;;  %v430_v40 = vsel %vm256_vm11, %v427_v38, %v429_v37  ;;  %v448_v43 = vld [vmem:[#allocation2 + $0x60] sm:$0xff] }
  0xd2   : > { %433 = vst [vmem:[#allocation2 + $0x80] sm:$0x3] %v430_v40 }
  0xd3   : > { %479 = vmatpush1.bf16.msra.mxu0 %v444_v36 }
  0xd4   : > { %480 = vmatprep.subr.bf16.mxu0 %v447_v39  ;;  %v451_v44 = vld [vmem:[#allocation2 + $0x78] sm:$0xff] }
  0xd5   : > { %v450_v45 = vld [vmem:[#allocation2 + $0x70] sm:$0xff] }
  0xd7   : > { %481 = vmatpush1.bf16.msra.mxu0 %v446_v41 }
  0xd8   : > { %482 = vmatprep.subr.bf16.mxu0 %v449_v42  ;;  %v453_v46 = vld [vmem:[#allocation2 + $0x88] sm:$0xff] }
  0xd9   : > { %v452_v47 = vld [vmem:[#allocation2 + $0x80] sm:$0xff] }
  0xdb   : > { %483 = vmatpush1.bf16.msra.mxu0 %v448_v43 }
  0xdc   : > { %484 = vmatprep.subr.bf16.mxu0 %v451_v44 }
  0xdf   : > { %485 = vmatpush1.bf16.msra.mxu0 %v450_v45 }
  0xe0   : > { %486 = vmatprep.subr.bf16.mxu0 %v453_v46 }
  0xe1   : > { %v458_v49 = vpop.permute.xlu0 %457 }
  0xe3   : > { %487 = vmatpush1.bf16.msra.mxu0 %v452_v47 }
  0xe6   : > { %503 = vmatmul.mubr.bf16.vlgmr.msra.gmra.mrb[0].mxu0 %v649_v48 }
 0x1b9   : > { %v504_v50 = vpop.f32.mrb[0].mxu0 }
 0x1ba   : > { %v505_v51 = vadd.f32 %v504_v50, %v458_v49  ;;  %v506_v52 = vpop.f32.mrb[1].mxu0 }
 0x1bb   : > { %v507_v53 = vadd.f32 %v506_v52, %v458_v49  ;;  %v508_v54 = vpop.f32.mrb[2].mxu0 }
 0x1bc   : > { %511 = vst [vmem:[%s211_s21] sm:$0xff] %v505_v51  ;;  %v509_v55 = vpop.f32.mrb[3].mxu0 }
 0x1bd   : > { %512 = vst [vmem:[%s211_s21 + $0x8] sm:$0xff] %v507_v53 }
 0x1be   : > { %777 = shalt.err (!%p774_p6)
}
 0x1bf   : > { %s778_s6 = scalar_lea.hbm %s1000_s28, 256  ;;  %s782_s9 = scalar_lea.hbm %s1050_s3, 512 }
 0x1c0   : > { %p779_p7 = scmp.ne.s32.totalorder %s1000_s28, %s778_s6  ;;  %p783_p0 = scmp.lt.u32.totalorder %s1000_s28, %s1050_s3 }
 0x1c1   : > { %p784_p2 = scmp.lt.u32.totalorder %s782_s9, %s778_s6  ;;  %p786_p4 = scmp.lt.u32.totalorder %s778_s6, %s1000_s28 }
 0x1c2   : > { %p780_p9 = pnand %p779_p7, %p1062_p8 }
 0x1c3   : > { %p785_p1 = por %p784_p2, %p783_p0 }
 0x1c4   : > { %p781_p12 = pneg %p780_p9 }
 0x1c5   : > { %p787_p10 = por %p786_p4, %p785_p1 }
 0x1c7   : > { %p788_p11 = pnand %p787_p10, %p781_p12 }
 0x1c9   : > { %791 = shalt.err (!%p788_p11)
}
 0x1ca   : > { %663 = dma.vmem_to_hbm [thread:$0]  (%p1062_p8), %s1002_s23, 256, %s1000_s28, %s514_s15  }
 0x1cb PF: > { %p675_p13 = scmp.ge.s32.totalorder %s846_s17, 2  ;;  %s542_s18 = sand.u32 1, %s826_s12  }
 0x1cc   : > { %p1063_p3 = scmp.ne.s32.totalorder %s1056_s24, 0  ;;  %s543_s19 = scalar_lea.sflag [#allocation5], %s542_s18 }
 0x1ce   : > { %p670_p5 = pnand %p675_p13, %p1063_p3 }
 0x1d0   : > { %821 = dma.done.wait (!%p670_p5), %s543_s19, 256  }
 0x1d1   : > { %823 = vsyncadd (!%p670_p5), %s543_s19, 4294967040  ;;  %s17_s17 = sadd.s32 1, %s846_s17   ;;  %s1064_s12 = smov %s830_s13 }
 0x1d2   : > { %p14_p6 = scmp.ge.s32.totalorder %s17_s17, 4   ;;  %s1065_s13 = smov %s834_s14 }
 0x1d3   : > { %s1066_s14 = smov %s931_s25  ;;  %s1067_s15 = smov %s842_s16 }
 0x1d4   : > { %s1068_s16 = smov %s1070_s20  ;;  %16 = sbr.rel (!%p14_p6) target bundleno = 5 (0x5), region = 76 }
 0x1db   :  { %548 = vsyncpa [#allocation4], 1 }
 0x1dc   :  { %550 = vsyncpa [#allocation4 + $0x1], 1 }
 0x1dd   :  { %551 = vsyncpa [#allocation5], 1 }
 0x1de   :  { %553 = vsyncpa [#allocation5 + $0x1], 1 }

</bundles_post_ra>
